<compile_context>
chip_gen: v5e
topology: v5e:2x2
jax: 0.10.0
libtpu: 0.0.40
codegen_flags: <defaults>
</compile_context>

<pallas_src>
import functools

import jax
import jax.numpy as jnp
from jax.experimental import pallas as pl
from jax.experimental.pallas import tpu as pltpu

_EPS = 1e-5  # torch F.layer_norm default
_LANE = 128
_MiB = 1024 * 1024


def _layer_norm_kernel(x_ref, gamma_ref, beta_ref, o_ref, *, d_real):
    # x_ref: (tile_rows, Dp); gamma_ref/beta_ref: (1, Dp) already f32.
    x = x_ref[...].astype(jnp.float32)
    d_pad = x.shape[-1]
    inv_d = jnp.float32(1.0 / d_real)

    # Row reductions on the (otherwise idle) MXU: sum(x) = x @ ones.
    ones_col = jnp.ones((d_pad, 1), jnp.float32)
    s = jnp.dot(x, ones_col, preferred_element_type=jnp.float32)   # (rows, 1)
    mean = s * inv_d

    # Two-pass variance about the mean (torch semantics, numerically stable).
    c = x - mean
    if d_pad != d_real:
        # Exclude zero-padded lanes: they would contribute mean^2 each.
        lane = jax.lax.broadcasted_iota(jnp.int32, (1, d_pad), 1)
        c = jnp.where(lane < d_real, c, 0.0)
    var = jnp.dot(c * c, ones_col, preferred_element_type=jnp.float32) * inv_d
    inv = jax.lax.rsqrt(var + jnp.float32(_EPS))

    # TODO(synk): on v6e/v7x bf16 inputs, the final affine could run in bf16
    # (keeping stats in f32) to halve VALU cost; kept in f32 for simplicity.
    y = c * inv * gamma_ref[...] + beta_ref[...]
    o_ref[...] = y.astype(o_ref.dtype)


def _round_up(a, b):
    return ((a + b - 1) // b) * b


def _vmem_capacity_bytes():
    """Per-TensorCore VMEM capacity, defensively clamped on v7x."""
    cap = 64 * _MiB  # conservative default (v7x per-TC)
    is_v7 = False
    try:
        info = pltpu.get_tpu_info()
        cap = int(info.vmem_capacity_bytes)
        ver = ""
        for attr in ("chip_version", "chip_name", "version", "name"):
            v = getattr(info, attr, None)
            if v is not None:
                ver += str(v)
        is_v7 = "7" in ver
    except Exception:
        pass
    if is_v7:
        # v7x has 64 MiB per TensorCore; guard against chip-level reporting.
        cap = min(cap, 64 * _MiB)
    return cap


def _vmem_limit_bytes(cap):
    if cap <= 64 * _MiB:          # v7x-class part
        return min(cap * 3 // 4, 48 * _MiB)
    return min(cap * 3 // 4, 96 * _MiB)


def _pick_tile_rows(N, d_pad, dtype, cap):
    """Row tile targeting ~4 MiB x-blocks within a safe VMEM working set."""
    itemsize = jnp.dtype(dtype).itemsize
    sublane = {4: 8, 2: 16, 1: 32}.get(itemsize, 8)

    # Working-set budget: ~32 MiB on 128-MiB parts (v5e/v6e), ~16 MiB on v7x.
    budget = 32 * _MiB if cap > 64 * _MiB else 16 * _MiB

    # Per row: 2x double-buffered input block + 2x output block (native dtype)
    # + ~2 f32 row-sized temporaries (x upcast, centered values).
    per_row = d_pad * (2 * itemsize + 2 * itemsize + 2 * 4)
    tile_by_vmem = budget // max(per_row, 1)

    # HBM roofline sweet spot: ~4 MiB per x block.
    tile_by_block = max((4 * _MiB) // max(d_pad * itemsize, 1), sublane)

    tile = min(int(tile_by_vmem), int(tile_by_block))

    n_pad = _round_up(N, sublane)
    # Keep >= 4 grid steps when there are enough rows so the "parallel" row
    # axis can actually be split across TensorCores (v7x megacore).
    if n_pad >= 4 * sublane:
        tile = min(tile, max(sublane, (n_pad // 4 // sublane) * sublane))

    tile = max(sublane, (tile // sublane) * sublane)
    return min(tile, n_pad)


def layer_norm(x, gamma, beta, *, tile_rows=None):
    """LayerNorm over the last dim of x, with per-feature gamma/beta."""
    orig_shape = x.shape
    D = orig_shape[-1]
    x2 = x.reshape(-1, D)
    N = x2.shape[0]

    Dp = _round_up(D, _LANE)
    gamma2 = gamma.reshape(1, D).astype(jnp.float32)
    beta2 = beta.reshape(1, D).astype(jnp.float32)
    if Dp != D:
        # Lane-pad the hidden dim so every load/store is lane-dense; pad lanes
        # get gamma=beta=0 and are excluded from the stats in-kernel.
        pad = Dp - D
        x2 = jnp.pad(x2, ((0, 0), (0, pad)))
        gamma2 = jnp.pad(gamma2, ((0, 0), (0, pad)))
        beta2 = jnp.pad(beta2, ((0, 0), (0, pad)))

    cap = _vmem_capacity_bytes()
    if tile_rows is None:
        tile_rows = _pick_tile_rows(N, Dp, x2.dtype, cap)

    kernel = functools.partial(_layer_norm_kernel, d_real=D)

    out = pl.pallas_call(
        kernel,
        out_shape=jax.ShapeDtypeStruct((N, Dp), x.dtype),
        grid_spec=pltpu.PrefetchScalarGridSpec(
            num_scalar_prefetch=0,
            grid=(pl.cdiv(N, tile_rows),),
            in_specs=[
                pl.BlockSpec((tile_rows, Dp), lambda i: (i, 0)),
                pl.BlockSpec((1, Dp), lambda i: (0, 0)),
                pl.BlockSpec((1, Dp), lambda i: (0, 0)),
            ],
            out_specs=pl.BlockSpec((tile_rows, Dp), lambda i: (i, 0)),
        ),
        compiler_params=pltpu.CompilerParams(
            dimension_semantics=("parallel",),
            vmem_limit_bytes=_vmem_limit_bytes(cap),
        ),
    )(x2, gamma2, beta2)

    if Dp != D:
        out = out[:, :D]
    return out.reshape(orig_shape)


if __name__ == "__main__":
    key = jax.random.PRNGKey(0)
    batch, seq, hidden = 2, 8, 32

    # Module params: gamma = ones(dim), beta (buffer) = zeros(dim)
    gamma = jnp.ones((hidden,), jnp.float32)
    beta = jnp.zeros((hidden,), jnp.float32)

    x = jax.random.normal(key, (batch, seq, hidden), jnp.float32)

    y = layer_norm(x, gamma, beta)
    jax.block_until_ready(y)

    # Reference check against plain JAX layer norm (torch biased variance).
    mean = jnp.mean(x, axis=-1, keepdims=True)
    var = jnp.mean((x - mean) ** 2, axis=-1, keepdims=True)
    y_ref = (x - mean) / jnp.sqrt(var + _EPS) * gamma + beta
    assert jnp.allclose(y, y_ref, atol=1e-5, rtol=1e-5), "mismatch vs reference"

    print("KERNEL_OK")
</pallas_src>

<mosaic_0001>
module attributes {stable_mosaic.version = 11 : i64} {
  func.func @_layer_norm_kernel(%arg0: i32, %arg1: memref<16x128xf32, #tpu.memory_space<vmem>>, %arg2: memref<1x128xf32, #tpu.memory_space<vmem>>, %arg3: memref<1x128xf32, #tpu.memory_space<vmem>>, %arg4: memref<16x128xf32, #tpu.memory_space<vmem>>) attributes {dimension_semantics = [#tpu.dimension_semantics<parallel>], iteration_bounds = array<i64: 1>, scalar_prefetch = 0 : i64, scratch_operands = 0 : i64, tpu.core_type = #tpu.core_type<tc>, window_params = [{transform_indices = @transform_0, window_bounds = array<i64: 16, 128>}, {pipeline_mode = #tpu.pipeline_mode<synchronous>, transform_indices = @transform_1, window_bounds = array<i64: 1, 128>}, {pipeline_mode = #tpu.pipeline_mode<synchronous>, transform_indices = @transform_2, window_bounds = array<i64: 1, 128>}, {transform_indices = @transform_3, window_bounds = array<i64: 16, 128>}]} {
    %c0 = arith.constant 0 : index
    %c0_0 = arith.constant 0 : index
    %0 = vector.load %arg1[%c0, %c0_0] : memref<16x128xf32, #tpu.memory_space<vmem>>, vector<16x128xf32>
    %cst = arith.constant 1.000000e+00 : f32
    %1 = vector.broadcast %cst : f32 to vector<128x1xf32>
    %cst_1 = arith.constant dense<0.000000e+00> : vector<16x1xf32>
    %2 = tpu.matmul %0, %1, %cst_1 {dimension_numbers = #tpu.dot_dimension_numbers<[1], [0], [0], [1], [0, 0, 1, 1], [], []>} : vector<16x128xf32>, vector<128x1xf32>, vector<16x1xf32> -> vector<16x1xf32>
    %cst_2 = arith.constant 3.125000e-02 : f32
    %3 = vector.broadcast %cst_2 : f32 to vector<16x1xf32>
    %4 = arith.mulf %2, %3 : vector<16x1xf32>
    %5 = vector.broadcast %4 : vector<16x1xf32> to vector<16x128xf32>
    %6 = arith.subf %0, %5 : vector<16x128xf32>
    %7 = tpu.iota {dimensions = array<i32: 1>} : vector<1x128xi32>
    %c32_i32 = arith.constant 32 : i32
    %8 = vector.broadcast %c32_i32 : i32 to vector<1x128xi32>
    %9 = arith.cmpi slt, %7, %8 : vector<1x128xi32>
    %cst_3 = arith.constant 0.000000e+00 : f32
    %10 = vector.shape_cast %9 : vector<1x128xi1> to vector<1x128xi1>
    %11 = vector.broadcast %10 : vector<1x128xi1> to vector<16x128xi1>
    %12 = vector.broadcast %cst_3 : f32 to vector<16x128xf32>
    %13 = arith.select %11, %6, %12 : vector<16x128xi1>, vector<16x128xf32>
    %14 = arith.mulf %13, %13 : vector<16x128xf32>
    %cst_4 = arith.constant dense<0.000000e+00> : vector<16x1xf32>
    %15 = tpu.matmul %14, %1, %cst_4 {dimension_numbers = #tpu.dot_dimension_numbers<[1], [0], [0], [1], [0, 0, 1, 1], [], []>} : vector<16x128xf32>, vector<128x1xf32>, vector<16x1xf32> -> vector<16x1xf32>
    %cst_5 = arith.constant 3.125000e-02 : f32
    %16 = vector.broadcast %cst_5 : f32 to vector<16x1xf32>
    %17 = arith.mulf %15, %16 : vector<16x1xf32>
    %cst_6 = arith.constant 9.99999974E-6 : f32
    %18 = vector.broadcast %cst_6 : f32 to vector<16x1xf32>
    %19 = arith.addf %17, %18 : vector<16x1xf32>
    %20 = math.rsqrt %19 : vector<16x1xf32>
    %21 = vector.broadcast %20 : vector<16x1xf32> to vector<16x128xf32>
    %22 = arith.mulf %13, %21 : vector<16x128xf32>
    %c0_7 = arith.constant 0 : index
    %c0_8 = arith.constant 0 : index
    %23 = vector.load %arg2[%c0_7, %c0_8] : memref<1x128xf32, #tpu.memory_space<vmem>>, vector<1x128xf32>
    %24 = vector.broadcast %23 : vector<1x128xf32> to vector<16x128xf32>
    %25 = arith.mulf %22, %24 : vector<16x128xf32>
    %c0_9 = arith.constant 0 : index
    %c0_10 = arith.constant 0 : index
    %26 = vector.load %arg3[%c0_9, %c0_10] : memref<1x128xf32, #tpu.memory_space<vmem>>, vector<1x128xf32>
    %27 = vector.broadcast %26 : vector<1x128xf32> to vector<16x128xf32>
    %28 = arith.addf %25, %27 : vector<16x128xf32>
    %c0_11 = arith.constant 0 : index
    %c0_12 = arith.constant 0 : index
    %29 = vector.load %arg4[%c0_11, %c0_12] : memref<16x128xf32, #tpu.memory_space<vmem>>, vector<16x128xf32>
    tpu.vector_store %arg4[%c0_11, %c0_12], %28 {strides = array<i32>} : memref<16x128xf32, #tpu.memory_space<vmem>>, vector<16x128xf32>,
    return
  }
  func.func @transform_0(%arg0: i32) -> (i32, i32) {
    %c0_i32 = arith.constant 0 : i32
    %c0_i32_0 = arith.constant 0 : i32
    return %arg0, %c0_i32 : i32, i32
  }
  func.func @transform_1(%arg0: i32) -> (i32, i32) {
    %c0_i32 = arith.constant 0 : i32
    %c0_i32_0 = arith.constant 0 : i32
    %c0_i32_1 = arith.constant 0 : i32
    return %c0_i32, %c0_i32_0 : i32, i32
  }
  func.func @transform_2(%arg0: i32) -> (i32, i32) {
    %c0_i32 = arith.constant 0 : i32
    %c0_i32_0 = arith.constant 0 : i32
    %c0_i32_1 = arith.constant 0 : i32
    return %c0_i32, %c0_i32_0 : i32, i32
  }
  func.func @transform_3(%arg0: i32) -> (i32, i32) {
    %c0_i32 = arith.constant 0 : i32
    %c0_i32_0 = arith.constant 0 : i32
    return %arg0, %c0_i32 : i32, i32
  }
}

</mosaic_0001>

<bundles_post_ra>
// kernel: tpu_custom_call.1
= control target key start
LH: loop header
LB: loop body
LE: loop exit
PB: predicated region body
PF: predicated region fallthrough
CT: control target
= control target key end

     0   :  { %8 = vsyncpa [#allocation3], 0  ;;  %s420_s0 = inlined_call_operand.hbm [shape: f32[16,128], index: 0, kind: input, shape index: {}]   ;;  %s421_s1 = inlined_call_operand.hbm [shape: f32[1,128], index: 1, kind: input, shape index: {}]   ;;  %s422_s2 = inlined_call_operand.vmem [shape: f32[1,128], index: 2, kind: input, shape index: {}]   ;;  %s423_s3 = inlined_call_operand.hbm [shape: f32[16,128], index: 3, kind: output, shape index: {}]  }
   0x1   :  { %9 = vsyncpa [#allocation6], 0 }
   0x2   :  { %10 = vsyncpa [#allocation4], 0  ;;  %s15_s14 = sshll.u32 %s420_s0, 4  ;;  %s311_s15 = smov [#allocation2]   ;;  %s16_s14 = int_to_ptr.hbm [resolvable:$true] %s15_s14 }
   0x3   :  { %s17_s16 = sshll.u32 %s311_s15, 4  ;;  %s29_s19 = sshll.u32 %s421_s1, 4  ;;  %s18_s16 = int_to_ptr.vmem [resolvable:$true] %s17_s16  ;;  %s30_s19 = int_to_ptr.hbm [resolvable:$true] %s29_s19 }
   0x4   :  { %s312_s20 = smov 128   ;;  %s313_s21 = smov 8  }
   0x5   :  { %23 = dma.hbm_to_vmem [thread:$0]  %s16_s14, 256, %s18_s16, [#allocation3], %s312_s20, %s312_s20, %s313_s21  }
   0x6   :  { %s314_s22 = smov [#allocation5]  }
   0x7   :  { %s31_s23 = sshll.u32 %s314_s22, 4  ;;  %s32_s23 = int_to_ptr.vmem [resolvable:$true] %s31_s23 }
   0x8   :  { %34 = dma.hbm_to_vmem [thread:$0]  %s30_s19, 16, %s32_s23, [#allocation6]  }
   0x9   :  { %305 = dma.done.wait [#allocation3], 256  }
   0xa   :  { %306 = vsyncadd [#allocation3], 4294967040 }
   0xb   :  { %307 = dma.done.wait [#allocation6], 16  }
   0xc   :  { %308 = vsyncadd [#allocation6], 4294967280  ;;  %v315_v0 = vmov 1.0   ;;  %v46_v1 = vld [vmem:[#allocation2 + $0x8] sm:$0xff]  ;;  %v45_v2 = vld [vmem:[#allocation2] sm:$0xff]  ;;  %v316_v3 = vmov 0   ;;  %v84_v8 = vlaneseq }
   0xd   :  { %186 = vmatpush.msra.mxu2 %v315_v0  ;;  %47 = vmatpush.msra.mxu0 %v315_v0  ;;  %v227_v38 = vld [vmem:[#allocation5] ss:$0 sm:$0xff]  ;;  %v228_v40 = vld [vmem:[%s422_s2] ss:$0 sm:$0xff]  ;;  %s317_s24 = smov [#allocation7]   ;;  %s172_s28 = sshll.u32 %s423_s3, 4  ;;  %s173_s28 = int_to_ptr.hbm [resolvable:$true] %s172_s28 }
   0xe   :  { %202 = vmatpush.msra.mxu3 %v315_v0  ;;  %93 = vmatpush.msra.mxu1 %v315_v0  ;;  %v85_v9 = vand.u32 127, %v84_v8  ;;  %s170_s25 = sshll.u32 %s317_s24, 4  ;;  %s171_s25 = int_to_ptr.vmem [resolvable:$true] %s170_s25 }
   0xf   :  { %187 = vmatpush.msra.mxu2 %v315_v0  ;;  %48 = vmatpush.msra.mxu0 %v315_v0 }
  0x10   :  { %203 = vmatpush.msra.mxu3 %v315_v0  ;;  %94 = vmatpush.msra.mxu1 %v315_v0  ;;  %vm86_vm0 = vcmp.lt.s32.totalorder %v85_v9, 32 }
  0x11   :  { %188 = vmatpush.msra.mxu2 %v315_v0  ;;  %49 = vmatpush.msra.mxu0 %v315_v0 }
  0x12   :  { %204 = vmatpush.msra.mxu3 %v315_v0  ;;  %95 = vmatpush.msra.mxu1 %v315_v0 }
  0x13   :  { %189 = vmatpush.msra.mxu2 %v315_v0  ;;  %50 = vmatpush.msra.mxu0 %v315_v0 }
  0x14   :  { %205 = vmatpush.msra.mxu3 %v315_v0  ;;  %96 = vmatpush.msra.mxu1 %v315_v0 }
  0x15   :  { %190 = vmatpush.msra.mxu2 %v315_v0  ;;  %51 = vmatpush.msra.mxu0 %v315_v0 }
  0x16   :  { %206 = vmatpush.msra.mxu3 %v315_v0  ;;  %97 = vmatpush.msra.mxu1 %v315_v0 }
  0x17   :  { %191 = vmatpush.msra.mxu2 %v315_v0  ;;  %52 = vmatpush.msra.mxu0 %v315_v0 }
  0x18   :  { %207 = vmatpush.msra.mxu3 %v315_v0  ;;  %98 = vmatpush.msra.mxu1 %v315_v0 }
  0x19   :  { %192 = vmatpush.msra.mxu2 %v315_v0  ;;  %53 = vmatpush.msra.mxu0 %v315_v0 }
  0x1a   :  { %208 = vmatpush.msra.mxu3 %v315_v0  ;;  %99 = vmatpush.msra.mxu1 %v315_v0 }
  0x1b   :  { %193 = vmatpush.msra.mxu2 %v315_v0  ;;  %54 = vmatpush.msra.mxu0 %v315_v0 }
  0x1c   :  { %209 = vmatpush.msra.mxu3 %v315_v0  ;;  %100 = vmatpush.msra.mxu1 %v315_v0 }
  0x1d   :  { %194 = vmatpush.msra.mxu2 %v315_v0  ;;  %55 = vmatpush.msra.mxu0 %v315_v0 }
  0x1e   :  { %210 = vmatpush.msra.mxu3 %v315_v0  ;;  %101 = vmatpush.msra.mxu1 %v315_v0 }
  0x1f   :  { %195 = vmatpush.msra.mxu2 %v315_v0  ;;  %56 = vmatpush.msra.mxu0 %v315_v0 }
  0x20   :  { %211 = vmatpush.msra.mxu3 %v315_v0  ;;  %102 = vmatpush.msra.mxu1 %v315_v0 }
  0x21   :  { %196 = vmatpush.msra.mxu2 %v315_v0  ;;  %57 = vmatpush.msra.mxu0 %v315_v0 }
  0x22   :  { %212 = vmatpush.msra.mxu3 %v315_v0  ;;  %103 = vmatpush.msra.mxu1 %v315_v0 }
  0x23   :  { %197 = vmatpush.msra.mxu2 %v315_v0  ;;  %58 = vmatpush.msra.mxu0 %v315_v0 }
  0x24   :  { %213 = vmatpush.msra.mxu3 %v315_v0  ;;  %104 = vmatpush.msra.mxu1 %v315_v0 }
  0x25   :  { %198 = vmatpush.msra.mxu2 %v315_v0  ;;  %59 = vmatpush.msra.mxu0 %v315_v0 }
  0x26   :  { %214 = vmatpush.msra.mxu3 %v315_v0  ;;  %105 = vmatpush.msra.mxu1 %v315_v0 }
  0x27   :  { %199 = vmatpush.msra.mxu2 %v315_v0  ;;  %60 = vmatpush.msra.mxu0 %v315_v0 }
  0x28   :  { %215 = vmatpush.msra.mxu3 %v315_v0  ;;  %106 = vmatpush.msra.mxu1 %v315_v0 }
  0x29   :  { %200 = vmatpush.msra.mxu2 %v315_v0  ;;  %61 = vmatpush.msra.mxu0 %v315_v0 }
  0x2a   :  { %216 = vmatpush.msra.mxu3 %v315_v0  ;;  %107 = vmatpush.msra.mxu1 %v315_v0 }
  0x2b   :  { %201 = vmatpush.msra.mxu2 %v315_v0  ;;  %62 = vmatpush.msra.mxu0 %v315_v0 }
  0x2c   :  { %66 = vmatmul.f32.vlgmr.msra.gmra.mxu2 %v46_v1  ;;  %63 = vmatmul.f32.vlgmr.msra.gmra.mxu0 %v45_v2 }
  0x2d   :  { %217 = vmatpush.msra.mxu3 %v315_v0  ;;  %108 = vmatpush.msra.mxu1 %v315_v0 }
  0x2e   :  { %225 = vset.pattern.permute.xlu0 %v316_v3  ;;  %226 = vset.pattern.permute.xlu1 %v316_v3 }
  0xa9   :  { %v64_v6 = vpop.f32.mrf.mxu0 }
  0xaa   :  { %v70_v7 = vmul.f32 0.03125, %v64_v6 }
  0xaf   :  { %v67_v4 = vpop.f32.mrf.mxu2 }
  0xb0   :  { %v71_v5 = vmul.f32 0.03125, %v67_v4 }
  0xb2   :  { %79 = vperm.xlu0 %225, %v71_v5  }
  0xba   :  { %74 = vperm.xlu0 %225, %v70_v7  }
 0x124   :  { %v80_v10 = vpop.permute.xlu0 %79 }
 0x125   :  { %v83_v11 = vsub.f32 %v46_v1, %v80_v10 }
 0x127   :  { %v90_v12 = vsel %vm86_vm0, %v83_v11, 0.0 }
 0x128   :  { %v92_v13 = vmul.f32 %v90_v12, %v90_v12 }
 0x12a   :  { %112 = vmatmul.f32.vlgmr.msra.gmra.mxu3 %v92_v13 }
 0x12c   :  { %v75_v14 = vpop.permute.xlu0 %74 }
 0x12d   :  { %v82_v15 = vsub.f32 %v45_v2, %v75_v14 }
 0x12f   :  { %v89_v16 = vsel %vm86_vm0, %v82_v15, 0.0 }
 0x130   :  { %v91_v17 = vmul.f32 %v89_v16, %v89_v16 }
 0x132   :  { %109 = vmatmul.f32.vlgmr.msra.gmra.mxu1 %v91_v17 }
 0x1ad   :  { %v113_v18 = vpop.f32.mrf.mxu3 }
 0x1ae   :  { %v117_v19 = vmul.f32 0.03125, %v113_v18 }
 0x1af   :  { %v110_v20 = vpop.f32.mrf.mxu1 }
 0x1b0   :  { %v119_v21 = vadd.f32 1e-05, %v117_v19  ;;  %v116_v22 = vmul.f32 0.03125, %v110_v20 }
 0x1b2   :  { %229 = vrsqrt.f32 %v119_v21  ;;  %v118_v23 = vadd.f32 1e-05, %v116_v22  ;;  %vm136_vm5 = vweird.f32 %v119_v21 }
 0x1b4   :  { %231 = vrsqrt.f32 %v118_v23  ;;  %vm126_vm2 = vweird.f32 %v118_v23 }
 0x1b8   :  { %v230_v24 = vpop.eup %229 }
 0x1b9   :  { %v131_v25 = vmul.f32 %v230_v24, %v119_v21  ;;  %vm137_vm4 = vweird.f32 %v230_v24 }
 0x1ba   :  { %v232_v26 = vpop.eup %231  ;;  %vm138_vm6 = vmor %vm136_vm5, %vm137_vm4 }
 0x1bb   :  { %v121_v27 = vmul.f32 %v232_v26, %v118_v23  ;;  %v132_v28 = vmul.f32 %v230_v24, %v131_v25  ;;  %vm127_vm1 = vweird.f32 %v232_v26 }
 0x1bc   :  { %vm128_vm3 = vmor %vm126_vm2, %vm127_vm1 }
 0x1bd   :  { %v122_v29 = vmul.f32 %v232_v26, %v121_v27  ;;  %v133_v31 = vmul.f32 0.5, %v132_v28 }
 0x1bf   :  { %v123_v30 = vmul.f32 0.5, %v122_v29  ;;  %v134_v34 = vsub.f32 1.5, %v133_v31 }
 0x1c1   :  { %v124_v32 = vsub.f32 1.5, %v123_v30  ;;  %v135_v36 = vmul.f32 %v230_v24, %v134_v34 }
 0x1c3   :  { %v125_v33 = vmul.f32 %v232_v26, %v124_v32  ;;  %v139_v37 = vsel %vm138_vm6, %v230_v24, %v135_v36 }
 0x1c5   :  { %v129_v35 = vsel %vm128_vm3, %v232_v26, %v125_v33 }
 0x1c6   :  { %142 = vperm.xlu1 %226, %v129_v35  }
 0x1ce   :  { %147 = vperm.xlu1 %226, %v139_v37  }
 0x238   :  { %v143_v39 = vpop.permute.xlu1 %142 }
 0x239   :  { %v150_v41 = vmul.f32 %v143_v39, %v89_v16 }
 0x23b   :  { %v156_v42 = vmul.f32 %v227_v38, %v150_v41 }
 0x23d   :  { %v162_v43 = vadd.f32 %v228_v40, %v156_v42 }
 0x23f   :  { %164 = vst [vmem:[#allocation7] sm:$0xff] %v162_v43 }
 0x240   :  { %v148_v44 = vpop.permute.xlu1 %147 }
 0x241   :  { %v151_v45 = vmul.f32 %v148_v44, %v90_v12 }
 0x243   :  { %v157_v46 = vmul.f32 %v227_v38, %v151_v45 }
 0x245   :  { %v163_v47 = vadd.f32 %v228_v40, %v157_v46 }
 0x247   :  { %165 = vst [vmem:[#allocation7 + $0x8] sm:$0xff] %v163_v47 }
 0x248   :  { %178 = dma.vmem_to_hbm [thread:$0]  %s171_s25, 256, %s173_s28, [#allocation4], %s312_s20, %s312_s20, %s313_s21  }
 0x249   :  { %309 = dma.done.wait [#allocation4], 256  }
 0x24a   :  { %310 = vsyncadd [#allocation4], 4294967040 }
 0x24b   :  { %183 = vsyncpa [#allocation3], 1 }
 0x24c   :  { %184 = vsyncpa [#allocation6], 1 }
 0x24d   :  { %185 = vsyncpa [#allocation4], 1 }

</bundles_post_ra>
